<compile_context>
chip_gen: v5e
topology: v5e:2x2
jax: 0.10.0
libtpu: 0.0.40
codegen_flags: <defaults>
</compile_context>

<pallas_src>
import functools

import jax
import jax.numpy as jnp
from jax import lax
from jax.experimental import pallas as pl
from jax.experimental.pallas import tpu as pltpu


# Fixed finite-difference kernels from the reference codebase (utils.update_kernel /
# utils.loss_kernel).  The update kernel is baked into the Pallas kernel body as the
# 4-tap cross stencil; these constants are kept only for documentation/reference.
UPDATE_KERNEL = jnp.array([[0.0, 1.0, 0.0],
                           [1.0, 0.0, 1.0],
                           [0.0, 1.0, 0.0]], dtype=jnp.float32) / 4.0

LOSS_KERNEL = jnp.array([[0.0, 1.0, 0.0],
                         [1.0, -4.0, 1.0],
                         [0.0, 1.0, 0.0]], dtype=jnp.float32)
# TODO(synk): fd_loss_kernel is only consumed by subclass loss/residual code, not by
# the forward iteration step; it is defined here for completeness only.


def _activation(y, act):
    if act == "sigmoid":
        # Exact identity sigmoid(y) = 0.5*(tanh(0.5*y)+1): one EUP push instead
        # of two (exp + reciprocal); EUP has a single VLIW slot.
        return 0.5 * (jnp.tanh(0.5 * y) + 1.0)
    if act == "clamp":
        return jnp.clip(y, 0.0, 1.0)
    if act == "none":
        return y
    raise NotImplementedError(act)


def _iter_kernel(x_ref, bc_rows_ref, bc_cols_ref, f_ref, o_ref, *, act, n_iters):
    """n_iters Jacobi steps on a (tb, H, W) batch block, boundary ring = bc.

    bc_rows_ref: (tb, 2, W) -- rows 0 and H-1 of bc.
    bc_cols_ref: (tb, H, 2) -- columns 0 and W-1 of bc.
    """
    tb, H, W = x_ref.shape
    f = f_ref[...]

    # Hoisted boundary machinery (computed once, reused every iteration).
    row = lax.broadcasted_iota(jnp.int32, (tb, H, W), 1)
    col = lax.broadcasted_iota(jnp.int32, (tb, H, W), 2)
    interior = (row > 0) & (row < H - 1) & (col > 0) & (col < W - 1)

    top = bc_rows_ref[:, 0:1, :]       # (tb, 1, W)
    bot = bc_rows_ref[:, 1:2, :]       # (tb, 1, W)
    left = bc_cols_ref[:, :, 0:1]      # (tb, H, 1)
    right = bc_cols_ref[:, :, 1:2]     # (tb, H, 1)
    # Recompose bc on the ring from the four thin slabs (interior values of
    # bc_ring are never used -- masked by `interior` below).
    bc_ring = jnp.where(row == 0, top,
                        jnp.where(row == H - 1, bot,
                                  jnp.where(col == 0, left, right)))

    def step(x):
        # 4-tap cross stencil: four single-axis rolls (XLU rotates).  The
        # symmetric +1/-1 pairs make rotate direction immaterial; wrap-around
        # only touches the boundary ring, overwritten with bc below.
        # TODO(synk): if a bundle dump shows XLU saturating in the fused loop,
        # source the N/S neighbors from row-shifted slices of a VMEM scratch
        # carry instead of axis-1 rolls (halves XLU work).
        y = 0.25 * (jnp.roll(x, 1, axis=1) + jnp.roll(x, -1, axis=1)
                    + jnp.roll(x, 1, axis=2) + jnp.roll(x, -1, axis=2)
                    + f)
        y = _activation(y, act)
        # Dirichlet ring folded into the value -> one dense, unmasked store.
        return jnp.where(interior, y, bc_ring)

    x = x_ref[...]
    if n_iters == 1:
        x = step(x)
    else:
        # Iteration 1 intentionally sees x's original boundary values as
        # neighbors (exactly as N sequential forward() calls would); every
        # output carries bc on the ring.
        x = lax.fori_loop(0, n_iters, lambda _, v: step(v), x)
    o_ref[...] = x.astype(o_ref.dtype)


def _round_up(v, m):
    return (v + m - 1) // m * m


def _vmem_capacity_bytes():
    try:
        return int(pltpu.get_tpu_info().vmem_capacity_bytes)
    except Exception:
        return 64 * 1024 * 1024  # conservative (v7x per-core VMEM)


def _choose_batch_block(B, H, W, n_iters):
    """Images per grid step + scoped-VMEM limit, sized by TPU generation.

    Block budget per array: ~cap/32 for the single step (4 MiB on 128-MiB
    v5e/v6e, 2 MiB on 64-MiB v7x) and half that for the fused loop, whose live
    full-tile values (carry, f, bc_ring, roll temps) sit on top of the
    double-buffered I/O.  On small-VMEM (v7x-like, 2-TC) chips prefer an even
    grid so both TensorCores stay busy; otherwise just prefer >= 2 steps so
    DMA/compute overlap.
    """
    cap = _vmem_capacity_bytes()
    small_vmem = cap <= 64 * 1024 * 1024  # v7x-like: 64 MiB / 2 TensorCores
    budget = cap // (64 if n_iters > 1 else 32)

    # Padded VMEM footprint of one f32 image (sublane->8, lane->128).
    padded_img = _round_up(H, 8) * _round_up(max(W, 1), 128) * 4
    # TODO(synk): images so large that a single one exceeds the budget would
    # need additional blocking along H; not implemented here.

    divisors = [d for d in range(1, B + 1) if B % d == 0]
    fitting = [d for d in divisors if d * padded_img <= budget] or [1]

    def multi_ok(d):
        g = B // d
        return g >= 2 and (not small_vmem or g % 2 == 0)

    multi = [d for d in fitting if multi_ok(d)]
    tb = max(multi) if multi else max(fitting)

    vmem_limit = min(cap * 3 // 4, 96 * 1024 * 1024)
    return tb, vmem_limit


def _pallas_iterate(x, bc, f, act, n_iters, donate_x=False):
    B, H, W = x.shape

    # Ring-only bc slabs: the kernel only needs bc on the boundary, so DMA
    # O(B*(H+W)) instead of the full O(B*H*W) array.
    bc_rows = jnp.stack([bc[:, 0, :], bc[:, H - 1, :]], axis=1)   # (B, 2, W)
    bc_cols = jnp.stack([bc[:, :, 0], bc[:, :, W - 1]], axis=2)   # (B, H, 2)

    tb, vmem_limit = _choose_batch_block(B, H, W, n_iters)

    # Blocks cover the full (H, W) extent, so the (8, 128) rule is satisfied
    # for any image size; only the batch axis is tiled.
    x_spec = pl.BlockSpec((tb, H, W), lambda i: (i, 0, 0))
    rows_spec = pl.BlockSpec((tb, 2, W), lambda i: (i, 0, 0))
    cols_spec = pl.BlockSpec((tb, H, 2), lambda i: (i, 0, 0))

    kernel = functools.partial(_iter_kernel, act=act, n_iters=n_iters)

    call_kwargs = {}
    if donate_x:
        # Reuse x's HBM buffer for the output (safe: each grid step reads its
        # x block before its output block is written back).
        call_kwargs["input_output_aliases"] = {0: 0}

    return pl.pallas_call(
        kernel,
        out_shape=jax.ShapeDtypeStruct((B, H, W), x.dtype),
        grid=(B // tb,),
        in_specs=[x_spec, rows_spec, cols_spec, x_spec],
        out_specs=x_spec,
        compiler_params=pltpu.CompilerParams(
            dimension_semantics=("parallel",),
            vmem_limit_bytes=vmem_limit,
        ),
        **call_kwargs,
    )(x, bc_rows, bc_cols, f)


@functools.partial(jax.jit, static_argnames=("act", "donate_x"))
def iterator_step(x, bc, f, *, act="none", donate_x=False):
    """Iterator.forward / iter_step: one Jacobi update over the whole batch."""
    return _pallas_iterate(x, bc, f, act, 1, donate_x)


@functools.partial(jax.jit, static_argnames=("n_iters", "act", "donate_x"))
def iterator_iterate(x, bc, f, n_iters, *, act="none", donate_x=False):
    """n_iters sequential forward() steps fused into a single pallas_call."""
    return _pallas_iterate(x, bc, f, act, int(n_iters), donate_x)


def _reference_step(x, bc, f, act="none"):
    """Plain-JAX reference of one forward() step (padded 3x3 cross conv)."""
    B, H, W = x.shape
    xp = jnp.pad(x, ((0, 0), (1, 1), (1, 1)))
    y = 0.25 * (xp[:, :-2, 1:-1] + xp[:, 2:, 1:-1]
                + xp[:, 1:-1, :-2] + xp[:, 1:-1, 2:])
    y = y + 0.25 * f
    if act == "sigmoid":
        y = jax.nn.sigmoid(y)
    elif act == "clamp":
        y = jnp.clip(y, 0.0, 1.0)
    row = jnp.arange(H)[None, :, None]
    col = jnp.arange(W)[None, None, :]
    interior = (row > 0) & (row < H - 1) & (col > 0) & (col < W - 1)
    return jnp.where(interior, y, bc)


if __name__ == "__main__":
    B, H, W = 2, 16, 16
    key = jax.random.PRNGKey(0)
    kx, kb, kf = jax.random.split(key, 3)
    x = jax.random.normal(kx, (B, H, W), dtype=jnp.float32)
    bc = jax.random.normal(kb, (B, H, W), dtype=jnp.float32)
    f = jax.random.normal(kf, (B, H, W), dtype=jnp.float32)

    # One forward() step (the module's semantics).
    out = jax.block_until_ready(iterator_step(x, bc, f, act="sigmoid"))
    ref = _reference_step(x, bc, f, act="sigmoid")
    assert out.shape == (B, H, W)
    assert jnp.allclose(out, ref, atol=1e-5, rtol=1e-5)

    # Fused multi-iteration variant: 5 forward() steps in a single pallas_call.
    n_iters = 5
    out_n = jax.block_until_ready(iterator_iterate(x, bc, f, n_iters, act="clamp"))
    ref_n = x
    for _ in range(n_iters):
        ref_n = _reference_step(ref_n, bc, f, act="clamp")
    assert jnp.allclose(out_n, ref_n, atol=1e-5, rtol=1e-5)

    print("KERNEL_OK")
</pallas_src>

<mosaic_0001>
module attributes {stable_mosaic.version = 11 : i64} {
  func.func @_iter_kernel(%arg0: i32, %arg1: memref<1x16x16xf32, #tpu.memory_space<vmem>>, %arg2: memref<1x2x16xf32, #tpu.memory_space<vmem>>, %arg3: memref<1x16x2xf32, #tpu.memory_space<vmem>>, %arg4: memref<1x16x16xf32, #tpu.memory_space<vmem>>, %arg5: memref<1x16x16xf32, #tpu.memory_space<vmem>>) attributes {dimension_semantics = [#tpu.dimension_semantics<parallel>], iteration_bounds = array<i64: 2>, scalar_prefetch = 0 : i64, scratch_operands = 0 : i64, tpu.core_type = #tpu.core_type<tc>, window_params = [{transform_indices = @transform_0, window_bounds = array<i64: 1, 16, 16>}, {transform_indices = @transform_1, window_bounds = array<i64: 1, 2, 16>}, {transform_indices = @transform_2, window_bounds = array<i64: 1, 16, 2>}, {transform_indices = @transform_3, window_bounds = array<i64: 1, 16, 16>}, {transform_indices = @transform_4, window_bounds = array<i64: 1, 16, 16>}]} {
    %c0 = arith.constant 0 : index
    %c0_0 = arith.constant 0 : index
    %c0_1 = arith.constant 0 : index
    %0 = vector.load %arg4[%c0, %c0_0, %c0_1] : memref<1x16x16xf32, #tpu.memory_space<vmem>>, vector<1x16x16xf32>
    %1 = tpu.iota {dimensions = array<i32: 1>} : vector<1x16x16xi32>
    %2 = tpu.iota {dimensions = array<i32: 2>} : vector<1x16x16xi32>
    %c0_i32 = arith.constant 0 : i32
    %3 = vector.broadcast %c0_i32 : i32 to vector<1x16x16xi32>
    %4 = arith.cmpi sgt, %1, %3 : vector<1x16x16xi32>
    %c15_i32 = arith.constant 15 : i32
    %5 = vector.broadcast %c15_i32 : i32 to vector<1x16x16xi32>
    %6 = arith.cmpi slt, %1, %5 : vector<1x16x16xi32>
    %7 = arith.andi %4, %6 : vector<1x16x16xi1>
    %c0_i32_2 = arith.constant 0 : i32
    %8 = vector.broadcast %c0_i32_2 : i32 to vector<1x16x16xi32>
    %9 = arith.cmpi sgt, %2, %8 : vector<1x16x16xi32>
    %10 = arith.andi %7, %9 : vector<1x16x16xi1>
    %c15_i32_3 = arith.constant 15 : i32
    %11 = vector.broadcast %c15_i32_3 : i32 to vector<1x16x16xi32>
    %12 = arith.cmpi slt, %2, %11 : vector<1x16x16xi32>
    %13 = arith.andi %10, %12 : vector<1x16x16xi1>
    %c0_4 = arith.constant 0 : index
    %c0_5 = arith.constant 0 : index
    %c0_6 = arith.constant 0 : index
    %14 = vector.load %arg2[%c0_4, %c0_5, %c0_6] : memref<1x2x16xf32, #tpu.memory_space<vmem>>, vector<1x1x16xf32>
    %c0_7 = arith.constant 0 : index
    %c1 = arith.constant 1 : index
    %c0_8 = arith.constant 0 : index
    %15 = vector.load %arg2[%c0_7, %c1, %c0_8] : memref<1x2x16xf32, #tpu.memory_space<vmem>>, vector<1x1x16xf32>
    %c0_9 = arith.constant 0 : index
    %c0_10 = arith.constant 0 : index
    %c0_11 = arith.constant 0 : index
    %16 = vector.load %arg3[%c0_9, %c0_10, %c0_11] : memref<1x16x2xf32, #tpu.memory_space<vmem>>, vector<1x16x1xf32>
    %c0_12 = arith.constant 0 : index
    %c0_13 = arith.constant 0 : index
    %c1_14 = arith.constant 1 : index
    %17 = vector.load %arg3[%c0_12, %c0_13, %c1_14] : memref<1x16x2xf32, #tpu.memory_space<vmem>>, vector<1x16x1xf32>
    %c0_i32_15 = arith.constant 0 : i32
    %18 = vector.broadcast %c0_i32_15 : i32 to vector<1x16x16xi32>
    %19 = arith.cmpi eq, %1, %18 : vector<1x16x16xi32>
    %c15_i32_16 = arith.constant 15 : i32
    %20 = vector.broadcast %c15_i32_16 : i32 to vector<1x16x16xi32>
    %21 = arith.cmpi eq, %1, %20 : vector<1x16x16xi32>
    %c0_i32_17 = arith.constant 0 : i32
    %22 = vector.broadcast %c0_i32_17 : i32 to vector<1x16x16xi32>
    %23 = arith.cmpi eq, %2, %22 : vector<1x16x16xi32>
    %24 = vector.shape_cast %16 : vector<1x16x1xf32> to vector<1x16x1xf32>
    %25 = vector.broadcast %24 : vector<1x16x1xf32> to vector<1x16x16xf32>
    %26 = vector.shape_cast %17 : vector<1x16x1xf32> to vector<1x16x1xf32>
    %27 = vector.broadcast %26 : vector<1x16x1xf32> to vector<1x16x16xf32>
    %28 = arith.select %23, %25, %27 : vector<1x16x16xi1>, vector<1x16x16xf32>
    %29 = vector.shape_cast %15 : vector<1x1x16xf32> to vector<1x1x16xf32>
    %30 = vector.broadcast %29 : vector<1x1x16xf32> to vector<1x16x16xf32>
    %31 = arith.select %21, %30, %28 : vector<1x16x16xi1>, vector<1x16x16xf32>
    %32 = vector.shape_cast %14 : vector<1x1x16xf32> to vector<1x1x16xf32>
    %33 = vector.broadcast %32 : vector<1x1x16xf32> to vector<1x16x16xf32>
    %34 = arith.select %19, %33, %31 : vector<1x16x16xi1>, vector<1x16x16xf32>
    %c0_18 = arith.constant 0 : index
    %c0_19 = arith.constant 0 : index
    %c0_20 = arith.constant 0 : index
    %35 = vector.load %arg1[%c0_18, %c0_19, %c0_20] : memref<1x16x16xf32, #tpu.memory_space<vmem>>, vector<1x16x16xf32>
    %36 = vector.extract_strided_slice %35 {offsets = [0, 15, 0], sizes = [1, 1, 16], strides = [1, 1, 1]} : vector<1x16x16xf32> to vector<1x1x16xf32>
    %37 = vector.extract_strided_slice %35 {offsets = [0, 0, 0], sizes = [1, 15, 16], strides = [1, 1, 1]} : vector<1x16x16xf32> to vector<1x15x16xf32>
    %38 = tpu.concatenate %36, %37 in 1 : vector<1x1x16xf32>, vector<1x15x16xf32> -> vector<1x16x16xf32>
    %39 = vector.extract_strided_slice %35 {offsets = [0, 1, 0], sizes = [1, 15, 16], strides = [1, 1, 1]} : vector<1x16x16xf32> to vector<1x15x16xf32>
    %40 = vector.extract_strided_slice %35 {offsets = [0, 0, 0], sizes = [1, 1, 16], strides = [1, 1, 1]} : vector<1x16x16xf32> to vector<1x1x16xf32>
    %41 = tpu.concatenate %39, %40 in 1 : vector<1x15x16xf32>, vector<1x1x16xf32> -> vector<1x16x16xf32>
    %42 = arith.addf %38, %41 : vector<1x16x16xf32>
    %43 = vector.extract_strided_slice %35 {offsets = [0, 0, 15], sizes = [1, 16, 1], strides = [1, 1, 1]} : vector<1x16x16xf32> to vector<1x16x1xf32>
    %44 = vector.extract_strided_slice %35 {offsets = [0, 0, 0], sizes = [1, 16, 15], strides = [1, 1, 1]} : vector<1x16x16xf32> to vector<1x16x15xf32>
    %45 = tpu.concatenate %43, %44 in 2 : vector<1x16x1xf32>, vector<1x16x15xf32> -> vector<1x16x16xf32>
    %46 = arith.addf %42, %45 : vector<1x16x16xf32>
    %47 = vector.extract_strided_slice %35 {offsets = [0, 0, 1], sizes = [1, 16, 15], strides = [1, 1, 1]} : vector<1x16x16xf32> to vector<1x16x15xf32>
    %48 = vector.extract_strided_slice %35 {offsets = [0, 0, 0], sizes = [1, 16, 1], strides = [1, 1, 1]} : vector<1x16x16xf32> to vector<1x16x1xf32>
    %49 = tpu.concatenate %47, %48 in 2 : vector<1x16x15xf32>, vector<1x16x1xf32> -> vector<1x16x16xf32>
    %50 = arith.addf %46, %49 : vector<1x16x16xf32>
    %51 = arith.addf %50, %0 : vector<1x16x16xf32>
    %cst = arith.constant 2.500000e-01 : f32
    %52 = vector.broadcast %cst : f32 to vector<1x16x16xf32>
    %53 = arith.mulf %52, %51 : vector<1x16x16xf32>
    %cst_21 = arith.constant 5.000000e-01 : f32
    %54 = vector.broadcast %cst_21 : f32 to vector<1x16x16xf32>
    %55 = arith.mulf %54, %53 : vector<1x16x16xf32>
    %56 = math.tanh %55 : vector<1x16x16xf32>
    %cst_22 = arith.constant 1.000000e+00 : f32
    %57 = vector.broadcast %cst_22 : f32 to vector<1x16x16xf32>
    %58 = arith.addf %56, %57 : vector<1x16x16xf32>
    %cst_23 = arith.constant 5.000000e-01 : f32
    %59 = vector.broadcast %cst_23 : f32 to vector<1x16x16xf32>
    %60 = arith.mulf %59, %58 : vector<1x16x16xf32>
    %61 = arith.select %13, %60, %34 : vector<1x16x16xi1>, vector<1x16x16xf32>
    %c0_24 = arith.constant 0 : index
    %c0_25 = arith.constant 0 : index
    %c0_26 = arith.constant 0 : index
    %62 = vector.load %arg5[%c0_24, %c0_25, %c0_26] : memref<1x16x16xf32, #tpu.memory_space<vmem>>, vector<1x16x16xf32>
    tpu.vector_store %arg5[%c0_24, %c0_25, %c0_26], %61 {strides = array<i32>} : memref<1x16x16xf32, #tpu.memory_space<vmem>>, vector<1x16x16xf32>,
    return
  }
  func.func @transform_0(%arg0: i32) -> (i32, i32, i32) {
    %c0_i32 = arith.constant 0 : i32
    %c0_i32_0 = arith.constant 0 : i32
    %c0_i32_1 = arith.constant 0 : i32
    return %arg0, %c0_i32, %c0_i32_0 : i32, i32, i32
  }
  func.func @transform_1(%arg0: i32) -> (i32, i32, i32) {
    %c0_i32 = arith.constant 0 : i32
    %c0_i32_0 = arith.constant 0 : i32
    %c0_i32_1 = arith.constant 0 : i32
    return %arg0, %c0_i32, %c0_i32_0 : i32, i32, i32
  }
  func.func @transform_2(%arg0: i32) -> (i32, i32, i32) {
    %c0_i32 = arith.constant 0 : i32
    %c0_i32_0 = arith.constant 0 : i32
    %c0_i32_1 = arith.constant 0 : i32
    return %arg0, %c0_i32, %c0_i32_0 : i32, i32, i32
  }
  func.func @transform_3(%arg0: i32) -> (i32, i32, i32) {
    %c0_i32 = arith.constant 0 : i32
    %c0_i32_0 = arith.constant 0 : i32
    %c0_i32_1 = arith.constant 0 : i32
    return %arg0, %c0_i32, %c0_i32_0 : i32, i32, i32
  }
  func.func @transform_4(%arg0: i32) -> (i32, i32, i32) {
    %c0_i32 = arith.constant 0 : i32
    %c0_i32_0 = arith.constant 0 : i32
    %c0_i32_1 = arith.constant 0 : i32
    return %arg0, %c0_i32, %c0_i32_0 : i32, i32, i32
  }
}

</mosaic_0001>

<bundles_post_ra>
// kernel: iterator_step.1
= control target key start
LH: loop header
LB: loop body
LE: loop exit
PB: predicated region body
PF: predicated region fallthrough
CT: control target
= control target key end

     0   :  { %9 = vsyncpa [#allocation3], 0  ;;  %s781_s0 = inlined_call_operand.vmem [shape: f32[2,16,16], index: 0, kind: input, shape index: {}]   ;;  %s782_s1 = inlined_call_operand.vmem [shape: f32[2,2,16], index: 1, kind: input, shape index: {}]   ;;  %s783_s2 = inlined_call_operand.vmem [shape: f32[2,16,2], index: 2, kind: input, shape index: {}]   ;;  %s784_s3 = inlined_call_operand.vmem [shape: f32[2,16,16], index: 3, kind: input, shape index: {}]   ;;  %s785_s4 = inlined_call_operand.hbm [shape: f32[2,16,16], index: 4, kind: output, shape index: {}]  }
   0x1   :  { %11 = vsyncpa [#allocation3 + $0x1], 0  ;;  %s670_s15 = smov 0   ;;  %s672_s16 = smov 0  }
   0x2   :  { %s674_s17 = smov 0   ;;  %s676_s18 = smov 0  }
   0x3 LB: > { %s691_s19 = sadd.s32 4294967295, %s635_s18   ;;  %s494_s20 = sadd.s32 4294967294, %s635_s18   ;;  %s635_s18 = sphi %s676_s18, %s791_s18   ;;  %s631_s17 = sphi %s674_s17, %s790_s17   ;;  %s627_s16 = sphi %s672_s16, %s789_s16   ;;  %s623_s15 = sphi %s670_s15, %s788_s15  }
   0x4   : > { %s695_s21 = sadd.s32 1, %s635_s18   ;;  %s128_s22 = sadd.s32 1, %s631_s17 }
   0x5   : > { %s125_s23 = ssub.s32 %s635_s18, %s695_s21  ;;  %p138_p0 = scmp.ne.s32.totalorder %s631_s17, %s627_s16 }
   0x6   : > { %p126_p1 = scmp.eq.s32.totalorder %s125_s23, 0  ;;  %p139_p2 = scmp.eq.s32.totalorder %s691_s19, 1 }
   0x7   : > { %p144_p3 = scmp.ne.s32.totalorder %s627_s16, %s623_s15  ;;  %p145_p4 = scmp.eq.s32.totalorder %s494_s20, 1 }
   0x8   : > { %s706_s24 = scalar_select %p126_p1, %s631_s17, %s128_s22  }
   0x9   : > { %p708_p5 = por %p139_p2, %p138_p0  ;;  %p712_p6 = por %p145_p4, %p144_p3 }
   0xa   : > { %p497_p7 = scmp.ge.s32.totalorder %s635_s18, 1  ;;  %p194_p8 = scmp.lt.s32.totalorder %s635_s18, 3 }
   0xc   : > { %p195_p9 = pnand %p497_p7, %p194_p8 }
   0xd   : > { %p234_p10 = scmp.lt.s32.totalorder (!%p195_p9), %s691_s19, 1  ;;  %s639_s6 = smov (!%p195_p9), 1  }
   0xe   : > { %198 = sbr.rel (%p195_p9) target bundleno = 181 (0xb5), region = 36  ;;  %s640_s7 = smov (!%p195_p9), 113  }
   0xf   : > { %s641_s8 = smov (!%p195_p9), 127   ;;  %s642_s22 = smov (!%p195_p9), 15  }
  0x13   : > { %v637_v0 = vmov 1   ;;  %v638_v1 = vmov 0   ;;  %s235_s27 = scalar_select %p234_p10, %s691_s19, 1  ;;  %vm313_vm0 = vcmask 1040384   ;;  %vm319_vm1 = vcmask 1046528  }
  0x14   : > { %564 = vset.pattern.permute.xlu1 %v637_v0  ;;  %563 = vset.pattern.permute.xlu0 %v638_v1  ;;  %vm341_vm2 = vcmask 7168   ;;  %vm358_vm3 = vcmask 121856   ;;  %v255_v35 = vlaneseq  ;;  %vm377_vm15 = vcmask 130048  }
  0x15   : > { %562 = vset.pattern.permute.xlu2 %v638_v1  ;;  %s720_s28 = sshll.u32 %s235_s27, 4  ;;  %s501_s9 = sshll.u32 %s235_s27, 1 }
  0x16   : > { %s238_s5 = scalar_lea.vmem %s781_s0, %s720_s28  ;;  %s729_s12 = scalar_lea.vmem %s782_s1, %s501_s9  ;;  %v256_v40 = vshrl.u32 %v255_v35, 7  ;;  %v259_v44 = vand.u32 127, %v255_v35 }
  0x17   : > { %v307_v2 = vld [vmem:[%s238_s5] sm:$0xff]  ;;  %v308_v3 = vld [vmem:[%s238_s5 + $0x8] sm:$0xff]  ;;  %s247_s20 = scalar_lea.vmem %s783_s2, %s720_s28  ;;  %s252_s29 = scalar_lea.vmem %s784_s3, %s720_s28 }
  0x18   : > { %335 = vrot.lane.b32.xlu1 %v307_v2, %s639_s6  ;;  %329 = vrot.lane.b32.xlu0 %v307_v2, %s640_s7  ;;  %v274_v4 = vld [vmem:[%s247_s20] sm:$0xff]  ;;  %v275_v5 = vld [vmem:[%s247_s20 + $0x8] sm:$0xff]  ;;  %v310_v9 = vrot.slane %v308_v3, 7  ;;  %v321_v10 = vrot.slane %v308_v3, 1  ;;  %v314_v11 = vrot.slane %v307_v2, 7  ;;  %v320_v12 = vrot.slane %v307_v2, 1 }
  0x19   : > { %346 = vrot.lane.b32.xlu2 %v307_v2, %s641_s8  ;;  %v254_v28 = vld [vmem:[%s252_s29 + $0x8] sm:$0xff]  ;;  %v253_v30 = vld [vmem:[%s252_s29] sm:$0xff]  ;;  %s231_s28 = sand.u32 1, %s627_s16   ;;  %v257_v43 = vadd.s32 8, %v256_v40  ;;  %s514_s5 = sshll.u32 %s691_s19, 4  ;;  %vm266_vm4 = vcmp.gt.s32.totalorder %v259_v44, 0 }
  0x1a   : > { %v318_v16 = vsel %vm313_vm0, %v310_v9, %v314_v11  ;;  %v322_v17 = vsel %vm319_vm1, %v320_v12, %v321_v10  ;;  %v315_v18 = vsel %vm313_vm0, %v314_v11, %v310_v9  ;;  %v326_v19 = vsel %vm319_vm1, %v321_v10, %v320_v12  ;;  %s498_s30 = sshll.u32 %s231_s28, 4  ;;  %v568_v47 = vld [vmem:[%s729_s12 + $0x1] ss:$0 sm:$0xff]  ;;  %v567_v53 = vld [vmem:[%s729_s12] ss:$0 sm:$0xff]  ;;  %s381_s11 = scalar_lea.sflag [#allocation3], %s231_s28 }
  0x1b   : > { %v327_v20 = vadd.f32 %v322_v17, %v318_v16  ;;  %v328_v21 = vadd.f32 %v326_v19, %v315_v18  ;;  %vm263_vm5 = vcmp.lt.s32.totalorder %v257_v43, 15  ;;  %vm260_vm6 = vcmp.gt.s32.totalorder %v256_v40, 0  ;;  %s233_s19 = scalar_lea.vmem [#allocation2], %s498_s30 }
  0x1c   : > { %vm280_vm7 = vcmp.eq.s32.totalorder %v259_v44, 0  ;;  %vm269_vm8 = vcmp.lt.s32.totalorder %v259_v44, 15  ;;  %vm268_vm9 = vmand %vm263_vm5, %vm266_vm4  ;;  %vm279_vm10 = vcmp.eq.s32.totalorder %v257_v43, 15  ;;  %s393_s9 = sshll.u32 %s233_s19, 4  ;;  %vm276_vm12 = vcmp.eq.s32.totalorder %v256_v40, 0  ;;  %s394_s9 = int_to_ptr.vmem [resolvable:$true] %s393_s9 }
  0x1d   : > { %vm267_vm11 = vmand %vm260_vm6, %vm266_vm4 }
  0x1e   : > { %vm271_vm13 = vmand %vm268_vm9, %vm269_vm8 }
  0x1f   : > { %vm270_vm14 = vmand %vm267_vm11, %vm269_vm8 }
  0x20   : > { %337 = vrot.lane.b32.xlu1 %v308_v3, %s639_s6  ;;  %331 = vrot.lane.b32.xlu0 %v308_v3, %s640_s7 }
  0x21   : > { %348 = vrot.lane.b32.xlu2 %v308_v3, %s641_s8  ;;  %s392_s8 = scalar_lea.hbm %s785_s4, %s514_s5 }
  0x22   : > { %s395_s10 = sshll.u32 %s392_s8, 4  ;;  %s396_s10 = int_to_ptr.hbm [resolvable:$true] %s395_s10 }
  0x23   : > { %s587_s12 = sshra.s32 %s396_s10, 4  ;;  %s588_s12 = int_to_ptr.hbm [resolvable:$true] %s587_s12 }
  0x24   : > { %s589_s13 = scalar_lea.hbm %s588_s12, 16  ;;  %p594_p0 = scmp.lt.s32.totalorder %s588_s12, %s785_s4 }
  0x25   : > { %p590_p11 = scmp.ne.s32.totalorder %s588_s12, %s589_s13 }
  0x27   : > { %p591_p12 = pnand %p590_p11, %p708_p5 }
  0x28   : > { %354 = vrot.lane.b32.xlu1 %v308_v3, %s642_s22  ;;  %352 = vrot.lane.b32.xlu0 %v307_v2, %s642_s22  ;;  %s593_s22 = scalar_lea.hbm %s785_s4, 32 }
  0x29   : > { %283 = vperm.xlu2 %562, %v274_v4   ;;  %p592_p13 = pneg %p591_p12  ;;  %p595_p1 = scmp.lt.s32.totalorder %s593_s22, %s589_s13 }
  0x2b   : > { %p596_p2 = por %p595_p1, %p594_p0 }
  0x2d   : > { %p597_p3 = pnand %p596_p2, %p592_p13 }
  0x30   : > { %292 = vperm.xlu1 %564, %v274_v4   ;;  %288 = vperm.xlu0 %563, %v275_v5  }
  0x31   : > { %565 = vset.pattern.permute.xlu2 %v637_v0 }
  0x32   : > { %296 = vperm.xlu2 %565, %v275_v5  }
  0x38   : > { %566 = vset.pattern.permute.xlu0 %v637_v0 }
  0x73   : > { %v347_v6 = vpop.permute.xlu2 %346 }
  0x7b   : > { %v349_v13 = vpop.permute.xlu2 %348 }
  0x83   : > { %v284_v34 = vpop.permute.xlu2 %283 }
  0x8a   : > { %v336_v7 = vpop.permute.xlu1 %335  ;;  %v330_v8 = vpop.permute.xlu0 %329 }
  0x8b   : > { %v342_v22 = vsel %vm341_vm2, %v330_v8, %v336_v7 }
  0x8c   : > { %v344_v24 = vadd.f32 %v342_v22, %v327_v20  ;;  %v297_v45 = vpop.permute.xlu2 %296 }
  0x92   : > { %v338_v14 = vpop.permute.xlu1 %337  ;;  %v332_v15 = vpop.permute.xlu0 %331 }
  0x93   : > { %v343_v23 = vsel %vm341_vm2, %v332_v15, %v338_v14 }
  0x94   : > { %v345_v25 = vadd.f32 %v343_v23, %v328_v21 }
  0x9a   : > { %v355_v26 = vpop.permute.xlu1 %354  ;;  %v353_v27 = vpop.permute.xlu0 %352 }
  0x9b   : > { %v360_v29 = vsel %vm358_vm3, %v349_v13, %v355_v26  ;;  %v359_v31 = vsel %vm358_vm3, %v347_v6, %v353_v27 }
  0x9c   : > { %v362_v32 = vadd.f32 %v360_v29, %v345_v25  ;;  %v361_v33 = vadd.f32 %v359_v31, %v344_v24 }
  0x9e   : > { %v364_v36 = vadd.f32 %v362_v32, %v254_v28  ;;  %v363_v37 = vadd.f32 %v361_v33, %v253_v30 }
  0xa0   : > { %v366_v38 = vmul.f32 0.25, %v364_v36  ;;  %v365_v39 = vmul.f32 0.25, %v363_v37 }
  0xa2   : > { %v368_v41 = vmul.f32 0.5, %v366_v38  ;;  %v367_v42 = vmul.f32 0.5, %v365_v39  ;;  %v289_v46 = vpop.permute.xlu0 %288  ;;  %v293_v48 = vpop.permute.xlu1 %292 }
  0xa3   : > { %v300_v49 = vsel %vm280_vm7, %v289_v46, %v297_v45  ;;  %v299_v55 = vsel %vm280_vm7, %v284_v34, %v293_v48 }
  0xa4   : > { %569 = vtanh.f32 %v368_v41  ;;  %v303_v56 = vsel %vm279_vm10, %v568_v47, %v300_v49  ;;  %v305_v59 = vsel %vm276_vm12, %v567_v53, %v299_v55 }
  0xa5   : > { %571 = vtanh.f32 %v367_v42 }
  0xaa   : > { %v570_v50 = vpop.eup %569 }
  0xab   : > { %v572_v51 = vpop.eup %571  ;;  %v372_v52 = vadd.f32 1.0, %v570_v50 }
  0xac   : > { %v371_v54 = vadd.f32 1.0, %v572_v51 }
  0xad   : > { %v374_v57 = vmul.f32 0.5, %v372_v52 }
  0xae   : > { %v373_v58 = vmul.f32 0.5, %v371_v54 }
  0xaf   : > { %v376_v60 = vsel %vm271_vm13, %v374_v57, %v303_v56 }
  0xb0   : > { %v375_v61 = vsel %vm270_vm14, %v373_v58, %v305_v59  ;;  %379 = vst.msk [vmem:[%s233_s19 + $0x8] sm:$0xff] %vm377_vm15, %v376_v60 }
  0xb1   : > { %378 = vst.msk [vmem:[%s233_s19] sm:$0xff] %vm377_vm15, %v375_v61 }
  0xb2   : > { %600 = shalt.err (!%p597_p3)
}
  0xb3   : > { %s643_s29 = smov 128   ;;  %s644_s28 = smov 8  }
  0xb4   : > { %515 = dma.vmem_to_hbm [thread:$0]  (%p708_p5), %s394_s9, 256, %s396_s10, %s381_s11, %s643_s29, %s643_s29, %s644_s28  }
  0xb5 PF: > { %p521_p4 = scmp.ge.s32.totalorder %s635_s18, 2  ;;  %s410_s30 = sand.u32 1, %s623_s15  }
  0xb6   : > { %s411_s5 = scalar_lea.sflag [#allocation3], %s410_s30 }
  0xb7   : > { %p518_p7 = pnand %p521_p4, %p712_p6 }
  0xb9   : > { %p519_p8 = pneg %p518_p7 }
  0xbb   : > { %618 = dma.done.wait (%p519_p8), %s411_s5, 256  }
  0xbc   : > { %620 = vsyncadd (%p519_p8), %s411_s5, 4294967040  ;;  %p14_p9 = scmp.ge.s32.totalorder %s695_s21, 4   ;;  %s788_s15 = smov %s627_s16 }
  0xbd   : > { %s789_s16 = smov %s631_s17  ;;  %s790_s17 = smov %s706_s24 }
  0xbe   : > { %s791_s18 = smov %s695_s21  ;;  %16 = sbr.rel (!%p14_p9) target bundleno = 3 (0x3), region = 80 }
  0xc3   :  { %417 = vsyncpa [#allocation3], 1 }
  0xc4   :  { %419 = vsyncpa [#allocation3 + $0x1], 1 }

</bundles_post_ra>
